<compile_context>
chip_gen: v6e
topology: v6e:2x2x1
jax: 0.10.0
libtpu: 0.0.40
codegen_flags: <defaults>
</compile_context>

<pallas_src>
import functools

import jax
import jax.numpy as jnp
from jax.experimental import pallas as pl
from jax.experimental.pallas import tpu as pltpu

B, S, H, C = 2, 8, 32, 5          # batch, seq, hidden, num_classes
VOCAB, NSEG = 30, 2               # stand-in embedding table sizes
DR_RATE = 0.1                     # dr_rate (must be truthy: original forward
                                  # only defines `out` inside the dropout branch)


def bert_classifier_kernel(dr_rate,
                           vlen_ref,     # SMEM (B,)        int32
                           emb_ref,      # VMEM (1, S, H)   bf16
                           bits_ref,     # VMEM (1, 1, H)   int32 in [0, 2^23)
                           wp_ref,       # VMEM (H, H)      bf16
                           bp_ref,       # VMEM (1, H)      f32
                           wc_ref,       # VMEM (H, Cpad)   bf16
                           bc_ref,       # VMEM (1, Cpad)   f32
                           logits_ref):  # VMEM (1, 1, Cpad) f32
    i = pl.program_id(0)
    _, s, h = emb_ref.shape

    # --- gen_attention_mask: mask[j] = 1.0 iff j < valid_length[i] ----------
    vlen = vlen_ref[i]                                       # scalar from SMEM
    pos = jax.lax.broadcasted_iota(jnp.int32, (1, s, 1), 1)
    mask = (pos < vlen).astype(jnp.float32)                  # (1, s, 1) -> bcast over h

    # --- stand-in BERT "pooler": masked mean over seq, dense, tanh ----------
    emb = emb_ref[...].astype(jnp.float32)                   # (1, s, h)
    summed = jnp.sum(emb * mask, axis=1)                     # (1, h)
    denom = jnp.maximum(jnp.minimum(vlen, s).astype(jnp.float32), 1.0)
    pooled = summed * (1.0 / denom)                          # (1, h)
    pooler = jnp.tanh(
        jnp.dot(pooled.astype(jnp.bfloat16), wp_ref[...],
                preferred_element_type=jnp.float32)
        + bp_ref[...])                                       # (1, h) f32

    # --- dropout (training mode, p = dr_rate): integer threshold compare ----
    thresh = int(round(dr_rate * (1 << 23)))
    keep = (bits_ref[0] >= thresh).astype(jnp.float32)       # (1, h)
    dropped = pooler * keep * (1.0 / (1.0 - dr_rate))

    # --- classifier: Linear(hidden, num_classes), lane-dense padded store ---
    logits_ref[0] = (
        jnp.dot(dropped.astype(jnp.bfloat16), wc_ref[...],
                preferred_element_type=jnp.float32)
        + bc_ref[...])


def init_params(key, hidden=H, num_classes=C, vocab=VOCAB, nseg=NSEG, seq=S):
    ks = jax.random.split(key, 5)
    scale = 0.02
    return dict(
        tok_emb=scale * jax.random.normal(ks[0], (vocab, hidden), jnp.float32),
        seg_emb=scale * jax.random.normal(ks[1], (nseg, hidden), jnp.float32),
        pos_emb=scale * jax.random.normal(ks[2], (seq, hidden), jnp.float32),
        wp=scale * jax.random.normal(ks[3], (hidden, hidden), jnp.float32),
        bp=jnp.zeros((1, hidden), jnp.float32),
        # PyTorch Linear stores [C, H]; we keep it pre-transposed as [H, C].
        wc=scale * jax.random.normal(ks[4], (hidden, num_classes), jnp.float32),
        bc=jnp.zeros((1, num_classes), jnp.float32),
    )


def bert_classifier(token_ids, valid_length, segment_ids, params, key,
                    dr_rate=DR_RATE):
    bsz, seq = token_ids.shape
    hid = params["wp"].shape[0]
    ncls = params["wc"].shape[1]
    cpad = ((ncls + 127) // 128) * 128      # lane-dense classifier width

    # plain-JAX glue: embedding gathers for the stand-in BERT input.  bf16
    # halves HBM/VMEM traffic on the largest tensor; matmuls accumulate in f32.
    # TODO(synk): for real BERT sizes, fuse this gather into the kernel via
    # scalar-prefetched token ids instead of materializing emb in HBM.
    emb = (params["tok_emb"][token_ids]
           + params["seg_emb"][segment_ids]
           + params["pos_emb"][None, :seq, :]).astype(jnp.bfloat16)

    vlen = valid_length.astype(jnp.int32)   # scalar control data -> SMEM

    # Dropout randomness drawn with jax.random in the wrapper (no TPU-only
    # stateful PRNG, so the kernel also runs under interpret mode); compared
    # against an integer threshold inside the kernel.
    bits = jax.random.randint(key, (bsz, 1, hid), 0, 1 << 23, dtype=jnp.int32)

    wp = params["wp"].astype(jnp.bfloat16)
    bp = params["bp"].astype(jnp.float32)
    wc = jnp.zeros((hid, cpad), jnp.bfloat16).at[:, :ncls].set(
        params["wc"].astype(jnp.bfloat16))
    bc = jnp.zeros((1, cpad), jnp.float32).at[:, :ncls].set(
        params["bc"].astype(jnp.float32))

    kernel = functools.partial(bert_classifier_kernel, float(dr_rate))
    logits_pad = pl.pallas_call(
        kernel,
        grid=(bsz,),
        out_shape=jax.ShapeDtypeStruct((bsz, 1, cpad), jnp.float32),
        in_specs=[
            pl.BlockSpec(memory_space=pltpu.MemorySpace.SMEM),        # vlen
            pl.BlockSpec((1, seq, hid), lambda i: (i, 0, 0)),         # emb
            pl.BlockSpec((1, 1, hid), lambda i: (i, 0, 0)),           # bits
            pl.BlockSpec((hid, hid), lambda i: (0, 0)),               # pooler W
            pl.BlockSpec((1, hid), lambda i: (0, 0)),                 # pooler b
            pl.BlockSpec((hid, cpad), lambda i: (0, 0)),              # clf W (padded)
            pl.BlockSpec((1, cpad), lambda i: (0, 0)),                # clf b (padded)
        ],
        out_specs=pl.BlockSpec((1, 1, cpad), lambda i: (i, 0, 0)),
        compiler_params=pltpu.CompilerParams(
            dimension_semantics=("parallel",)),
    )(vlen, emb, bits, wp, bp, wc, bc)

    return logits_pad[:, 0, :ncls]


if __name__ == "__main__":
    key = jax.random.PRNGKey(0)
    pkey, tkey, dkey = jax.random.split(key, 3)

    params = init_params(pkey)
    token_ids = jax.random.randint(tkey, (B, S), 0, VOCAB, dtype=jnp.int32)
    segment_ids = jnp.zeros((B, S), dtype=jnp.int32)
    valid_length = jnp.array([5, 8], dtype=jnp.int32)

    logits = bert_classifier(token_ids, valid_length, segment_ids, params,
                             key=dkey)
    logits = jax.block_until_ready(logits)

    assert logits.shape == (B, C), logits.shape
    assert bool(jnp.all(jnp.isfinite(logits)))
    print("KERNEL_OK")
</pallas_src>

<mosaic_0001>
module attributes {stable_mosaic.version = 11 : i64} {
  func.func @bert_classifier_kernel(%arg0: i32, %arg1: memref<2xi32, #tpu.memory_space<smem>>, %arg2: memref<1x8x32xbf16, #tpu.memory_space<vmem>>, %arg3: memref<1x1x32xi32, #tpu.memory_space<vmem>>, %arg4: memref<32x32xbf16, #tpu.memory_space<vmem>>, %arg5: memref<1x32xf32, #tpu.memory_space<vmem>>, %arg6: memref<32x128xbf16, #tpu.memory_space<vmem>>, %arg7: memref<1x128xf32, #tpu.memory_space<vmem>>, %arg8: memref<1x1x128xf32, #tpu.memory_space<vmem>>) attributes {dimension_semantics = [#tpu.dimension_semantics<parallel>], iteration_bounds = array<i64: 2>, scalar_prefetch = 0 : i64, scratch_operands = 0 : i64, tpu.core_type = #tpu.core_type<tc>, window_params = [{transform_indices = @transform_0, window_bounds = array<i64: 2>}, {transform_indices = @transform_1, window_bounds = array<i64: 1, 8, 32>}, {transform_indices = @transform_2, window_bounds = array<i64: 1, 1, 32>}, {pipeline_mode = #tpu.pipeline_mode<synchronous>, transform_indices = @transform_3, window_bounds = array<i64: 32, 32>}, {pipeline_mode = #tpu.pipeline_mode<synchronous>, transform_indices = @transform_4, window_bounds = array<i64: 1, 32>}, {pipeline_mode = #tpu.pipeline_mode<synchronous>, transform_indices = @transform_5, window_bounds = array<i64: 32, 128>}, {pipeline_mode = #tpu.pipeline_mode<synchronous>, transform_indices = @transform_6, window_bounds = array<i64: 1, 128>}, {transform_indices = @transform_7, window_bounds = array<i64: 1, 1, 128>}]} {
    %0 = arith.index_cast %arg0 : i32 to index
    %1 = memref.load %arg1[%0] : memref<2xi32, #tpu.memory_space<smem>>
    %2 = tpu.iota {dimensions = array<i32: 1>} : vector<1x8x1xi32>
    %3 = vector.broadcast %1 : i32 to vector<1x8x1xi32>
    %4 = arith.cmpi slt, %2, %3 : vector<1x8x1xi32>
    %5 = arith.extui %4 : vector<1x8x1xi1> to vector<1x8x1xi32>
    %6 = arith.sitofp %5 : vector<1x8x1xi32> to vector<1x8x1xf32>
    %c0 = arith.constant 0 : index
    %c0_0 = arith.constant 0 : index
    %c0_1 = arith.constant 0 : index
    %7 = vector.load %arg2[%c0, %c0_0, %c0_1] : memref<1x8x32xbf16, #tpu.memory_space<vmem>>, vector<1x8x32xbf16>
    %8 = arith.extf %7 : vector<1x8x32xbf16> to vector<1x8x32xf32>
    %9 = vector.broadcast %6 : vector<1x8x1xf32> to vector<1x8x32xf32>
    %10 = arith.mulf %8, %9 : vector<1x8x32xf32>
    %cst = arith.constant dense<0.000000e+00> : vector<1x32xf32>
    %11 = vector.multi_reduction <add>, %10, %cst [1] : vector<1x8x32xf32> to vector<1x32xf32>
    %c8_i32 = arith.constant 8 : i32
    %12 = arith.minsi %1, %c8_i32 : i32
    %13 = arith.sitofp %12 : i32 to f32
    %cst_2 = arith.constant 1.000000e+00 : f32
    %14 = arith.maximumf %13, %cst_2 : f32
    %cst_3 = arith.constant 1.000000e+00 : f32
    %15 = arith.divf %cst_3, %14 : f32
    %16 = vector.broadcast %15 : f32 to vector<1x32xf32>
    %17 = arith.mulf %11, %16 : vector<1x32xf32>
    %18 = arith.truncf %17 : vector<1x32xf32> to vector<1x32xbf16>
    %c0_4 = arith.constant 0 : index
    %c0_5 = arith.constant 0 : index
    %19 = vector.load %arg4[%c0_4, %c0_5] : memref<32x32xbf16, #tpu.memory_space<vmem>>, vector<32x32xbf16>
    %cst_6 = arith.constant dense<0.000000e+00> : vector<1x32xf32>
    %20 = tpu.matmul %18, %19, %cst_6 {dimension_numbers = #tpu.dot_dimension_numbers<[1], [0], [0], [1], [0, 0, 1, 1], [], []>} : vector<1x32xbf16>, vector<32x32xbf16>, vector<1x32xf32> -> vector<1x32xf32>
    %c0_7 = arith.constant 0 : index
    %c0_8 = arith.constant 0 : index
    %21 = vector.load %arg5[%c0_7, %c0_8] : memref<1x32xf32, #tpu.memory_space<vmem>>, vector<1x32xf32>
    %22 = arith.addf %20, %21 : vector<1x32xf32>
    %23 = math.tanh %22 : vector<1x32xf32>
    %c0_9 = arith.constant 0 : index
    %c0_10 = arith.constant 0 : index
    %c0_11 = arith.constant 0 : index
    %24 = vector.load %arg3[%c0_9, %c0_10, %c0_11] : memref<1x1x32xi32, #tpu.memory_space<vmem>>, vector<1x1x32xi32>
    %25 = vector.shape_cast %24 : vector<1x1x32xi32> to vector<1x32xi32>
    %c838861_i32 = arith.constant 838861 : i32
    %26 = vector.broadcast %c838861_i32 : i32 to vector<1x32xi32>
    %27 = arith.cmpi sge, %25, %26 : vector<1x32xi32>
    %28 = arith.extui %27 : vector<1x32xi1> to vector<1x32xi32>
    %29 = arith.sitofp %28 : vector<1x32xi32> to vector<1x32xf32>
    %30 = arith.mulf %23, %29 : vector<1x32xf32>
    %cst_12 = arith.constant 1.11111116 : f32
    %31 = vector.broadcast %cst_12 : f32 to vector<1x32xf32>
    %32 = arith.mulf %30, %31 : vector<1x32xf32>
    %33 = arith.truncf %32 : vector<1x32xf32> to vector<1x32xbf16>
    %c0_13 = arith.constant 0 : index
    %c0_14 = arith.constant 0 : index
    %34 = vector.load %arg6[%c0_13, %c0_14] : memref<32x128xbf16, #tpu.memory_space<vmem>>, vector<32x128xbf16>
    %cst_15 = arith.constant dense<0.000000e+00> : vector<1x128xf32>
    %35 = tpu.matmul %33, %34, %cst_15 {dimension_numbers = #tpu.dot_dimension_numbers<[1], [0], [0], [1], [0, 0, 1, 1], [], []>} : vector<1x32xbf16>, vector<32x128xbf16>, vector<1x128xf32> -> vector<1x128xf32>
    %c0_16 = arith.constant 0 : index
    %c0_17 = arith.constant 0 : index
    %36 = vector.load %arg7[%c0_16, %c0_17] : memref<1x128xf32, #tpu.memory_space<vmem>>, vector<1x128xf32>
    %37 = arith.addf %35, %36 : vector<1x128xf32>
    %c0_18 = arith.constant 0 : index
    %c0_19 = arith.constant 0 : index
    %c0_20 = arith.constant 0 : index
    %38 = vector.load %arg8[%c0_18, %c0_19, %c0_20] : memref<1x1x128xf32, #tpu.memory_space<vmem>>, vector<1x1x128xf32>
    %39 = vector.shape_cast %38 : vector<1x1x128xf32> to vector<1x128xf32>
    %40 = vector.shape_cast %37 : vector<1x128xf32> to vector<1x1x128xf32>
    tpu.vector_store %arg8[%c0_18, %c0_19, %c0_20], %40 {strides = array<i32>} : memref<1x1x128xf32, #tpu.memory_space<vmem>>, vector<1x1x128xf32>,
    return
  }
  func.func @transform_0(%arg0: i32) -> i32 {
    %c0_i32 = arith.constant 0 : i32
    %c0_i32_0 = arith.constant 0 : i32
    return %c0_i32 : i32
  }
  func.func @transform_1(%arg0: i32) -> (i32, i32, i32) {
    %c0_i32 = arith.constant 0 : i32
    %c0_i32_0 = arith.constant 0 : i32
    %c0_i32_1 = arith.constant 0 : i32
    return %arg0, %c0_i32, %c0_i32_0 : i32, i32, i32
  }
  func.func @transform_2(%arg0: i32) -> (i32, i32, i32) {
    %c0_i32 = arith.constant 0 : i32
    %c0_i32_0 = arith.constant 0 : i32
    %c0_i32_1 = arith.constant 0 : i32
    return %arg0, %c0_i32, %c0_i32_0 : i32, i32, i32
  }
  func.func @transform_3(%arg0: i32) -> (i32, i32) {
    %c0_i32 = arith.constant 0 : i32
    %c0_i32_0 = arith.constant 0 : i32
    %c0_i32_1 = arith.constant 0 : i32
    return %c0_i32, %c0_i32_0 : i32, i32
  }
  func.func @transform_4(%arg0: i32) -> (i32, i32) {
    %c0_i32 = arith.constant 0 : i32
    %c0_i32_0 = arith.constant 0 : i32
    %c0_i32_1 = arith.constant 0 : i32
    return %c0_i32, %c0_i32_0 : i32, i32
  }
  func.func @transform_5(%arg0: i32) -> (i32, i32) {
    %c0_i32 = arith.constant 0 : i32
    %c0_i32_0 = arith.constant 0 : i32
    %c0_i32_1 = arith.constant 0 : i32
    return %c0_i32, %c0_i32_0 : i32, i32
  }
  func.func @transform_6(%arg0: i32) -> (i32, i32) {
    %c0_i32 = arith.constant 0 : i32
    %c0_i32_0 = arith.constant 0 : i32
    %c0_i32_1 = arith.constant 0 : i32
    return %c0_i32, %c0_i32_0 : i32, i32
  }
  func.func @transform_7(%arg0: i32) -> (i32, i32, i32) {
    %c0_i32 = arith.constant 0 : i32
    %c0_i32_0 = arith.constant 0 : i32
    %c0_i32_1 = arith.constant 0 : i32
    return %arg0, %c0_i32, %c0_i32_0 : i32, i32, i32
  }
}

</mosaic_0001>

<bundles_post_ra>
// kernel: tpu_custom_call.1
= control target key start
LH: loop header
LB: loop body
LE: loop exit
PB: predicated region body
PF: predicated region fallthrough
CT: control target
= control target key end

     0   :  { %s1183_s0 = inlined_call_operand.hbm [shape: s32[2], index: 0, kind: input, shape index: {}]   ;;  %s1184_s1 = inlined_call_operand.hbm [shape: bf16[2,8,32], index: 1, kind: input, shape index: {}]   ;;  %s1185_s2 = inlined_call_operand.vmem [shape: s32[2,1,32], index: 2, kind: input, shape index: {}]   ;;  %s1186_s3 = inlined_call_operand.hbm [shape: bf16[32,32], index: 3, kind: input, shape index: {}]   ;;  %s1187_s4 = inlined_call_operand.vmem [shape: f32[1,32], index: 4, kind: input, shape index: {}]   ;;  %s1188_s5 = inlined_call_operand.hbm [shape: bf16[32,128], index: 5, kind: input, shape index: {}]   ;;  %s1189_s6 = inlined_call_operand.vmem [shape: f32[1,128], index: 6, kind: input, shape index: {}]   ;;  %s1190_s7 = inlined_call_operand.hbm [shape: f32[2,1,128], index: 7, kind: output, shape index: {}]  }
   0x1   :  { %1195 = sst [smem:[#allocation15_spill]] %s1183_s0 }
   0x2   :  { %1196 = sst [smem:[#allocation16_spill]] %s1186_s3 }
   0x3   :  { %12 = vsyncpa [#allocation5], 0 }
   0x4   :  { %13 = vsyncpa [#allocation3], 0 }
   0x5   :  { %15 = vsyncpa [#allocation3 + $0x1], 0 }
   0x6   :  { %16 = vsyncpa [#allocation8], 0 }
   0x7   :  { %17 = vsyncpa [#allocation4], 0 }
   0x8   :  { %19 = vsyncpa [#allocation4 + $0x1], 0  ;;  %s978_s24 = smov 0   ;;  %s980_s25 = smov 0  }
   0x9   :  { %s982_s26 = smov 0   ;;  %s984_s27 = smov 0  }
   0xa LB: > { %s999_s28 = sadd.s32 4294967295, %s926_s27   ;;  %s625_s29 = sadd.s32 4294967294, %s926_s27   ;;  %s926_s27 = sphi %s984_s27, %s1217_s27   ;;  %s922_s26 = sphi %s982_s26, %s1216_s26   ;;  %s918_s25 = sphi %s980_s25, %s1215_s25   ;;  %s914_s24 = sphi %s978_s24, %s1214_s24  }
   0xb   : > { %p66_p0 = scmp.ne.s32.totalorder %s918_s25, %s914_s24  ;;  %p1191_p1 = scmp.eq.s32.totalorder %s999_s28, 0 }
   0xc   : > { %p200_p2 = scmp.eq.s32.totalorder %s999_s28, 1  ;;  %p206_p3 = scmp.eq.s32.totalorder %s625_s29, 1 }
   0xd   : > { %p1008_p4 = por %p1191_p1, %p66_p0  ;;  %p626_p5 = scmp.ge.s32.totalorder %s926_s27, 1 }
   0xe   : > { %p1013_p6 = por %p206_p3, %p66_p0  ;;  %p213_p7 = scmp.lt.s32.totalorder %s926_s27, 3 }
   0xf   : > { %s1197_s30 = scalar_select %p1008_p4, 1, 0 }
  0x10   : > { %s1198_s8 = scalar_select %p1013_p6, 1, 0 }
  0x11   : > { %p1018_p8 = pnand %p626_p5, %p213_p7  ;;  %s928_s10 = smov [#allocation7]  }
  0x12   : > { %s234_s11 = sshll.u32 %s928_s10, 4  ;;  %s929_s13 = smov [#allocation9]   ;;  %s235_s11 = int_to_ptr.vmem [resolvable:$true] %s234_s11 }
  0x13   : > { %s1199_s9 = scalar_select %p1018_p8, 1, 0 }
  0x14   : > { %p689_p9 = pneg %p1018_p8  ;;  %s250_s14 = sshll.u32 %s929_s13, 4  ;;  %s251_s14 = int_to_ptr.vmem [resolvable:$true] %s250_s14 }
  0x15   : > { %s774_s15 = scalar_lea.vmem %s235_s11, 256  ;;  %p782_p5 = scmp.lt.s32.totalorder %s235_s11, %s235_s11 }
  0x16   : > { %p1027_p11 = pnand %p689_p9, %p1191_p1  ;;  %p775_p13 = scmp.ne.s32.totalorder %s235_s11, %s774_s15 }
  0x17   : > { %p783_p7 = scmp.lt.s32.totalorder %s774_s15, %s774_s15 }
  0x18   : > { %p765_p12 = pneg %p1027_p11 }
  0x19   : > { %p784_p10 = por %p783_p7, %p782_p5 }
  0x1a   : > { %p777_p0 = pnand %p775_p13, %p765_p12 }
  0x1c   : > { %p778_p3 = pneg %p777_p0 }
  0x1e   : > { %p785_p9 = pnand %p784_p10, %p778_p3 }
  0x20   : > { %788 = shalt.err (!%p785_p9)
}
  0x21   : > { %s930_s16 = smov 64   ;;  %s931_s17 = smov 4  }
  0x22   : > { %s1201_s3 = sld [smem:[#allocation16_spill]]  ;;  %s932_s20 = smov [#allocation2]  }
  0x23   : > { %s1202_s0 = sld [smem:[#allocation15_spill]]  ;;  %s811_s23 = scalar_lea.vmem %s251_s14, 256 }
  0x24   : > { %p812_p13 = scmp.ne.s32.totalorder %s251_s14, %s811_s23  ;;  %p819_p3 = scmp.lt.s32.totalorder %s251_s14, %s251_s14 }
  0x25   : > { %p820_p5 = scmp.lt.s32.totalorder %s811_s23, %s811_s23 }
  0x26   : > { %p814_p10 = pnand %p812_p13, %p765_p12 }
  0x27   : > { %p821_p7 = por %p820_p5, %p819_p3 }
  0x28   : > { %695 = dma.hbm_to_vmem [thread:$0]  (!%p1027_p11), %s1201_s3, 256, %s235_s11, [#allocation8], %s930_s16, %s930_s16, %s931_s17  }
  0x29   : > { %692 = dma.hbm_to_smem (!%p1027_p11), %s1202_s0, 16, %s932_s20, [#allocation5]  }
  0x2a   : > { %p815_p0 = pneg %p814_p10 }
  0x2c   : > { %p822_p9 = pnand %p821_p7, %p815_p0 }
  0x2e   : > { %825 = shalt.err (!%p822_p9)
}
  0x2f   : > { %698 = dma.hbm_to_vmem [thread:$0]  (!%p1027_p11), %s1188_s5, 256, %s251_s14, [#allocation8], %s930_s16, %s930_s16, %s931_s17  }
  0x30   : > { %s1055_s11 = sadd.s32 1, %s926_s27   ;;  %s53_s12 = sadd.s32 1, %s922_s26 }
  0x31   : > { %s50_s13 = ssub.s32 %s926_s27, %s1055_s11  ;;  %p60_p13 = scmp.ne.s32.totalorder %s922_s26, %s918_s25 }
  0x32   : > { %p51_p12 = scmp.eq.s32.totalorder %s50_s13, 0  ;;  %p61_p10 = scmp.eq.s32.totalorder %s926_s27, 0 }
  0x33   : > { %p710_p0 = scmp.lt.s32.totalorder %s926_s27, 2  ;;  %p1069_p5 = por %p200_p2, %p60_p13 }
  0x34   : > { %s1065_s15 = scalar_select %p51_p12, %s922_s26, %s53_s12  }
  0x35   : > { %p62_p3 = por %p61_p10, %p60_p13  ;;  %s267_s19 = sand.u32 1, %s922_s26  }
  0x36   : > { %s1203_s18 = scalar_select %p1069_p5, 1, 0 }
  0x37   : > { %s632_s20 = sshll.u32 %s926_s27, 6  ;;  %s631_s14 = sshll.u32 %s267_s19, 2 }
  0x38   : > { %s1078_s21 = scalar_lea.hbm %s1184_s1, %s632_s20  ;;  %s271_s22 = scalar_lea.vmem [#allocation6], %s631_s14 }
  0x39   : > { %s278_s23 = sshll.u32 %s271_s22, 4  ;;  %p1080_p11 = pnand %p710_p0, %p62_p3  ;;  %s279_s23 = int_to_ptr.vmem [resolvable:$true] %s278_s23 }
  0x3a   : > { %s268_s10 = scalar_lea.sflag [#allocation3], %s267_s19  ;;  %s826_s13 = scalar_lea.hbm %s1078_s21, 64 }
  0x3b   : > { %p827_p2 = scmp.ne.s32.totalorder %s1078_s21, %s826_s13  ;;  %p828_p7 = pneg %p1080_p11 }
  0x3c   : > { %s831_s16 = scalar_lea.hbm %s1184_s1, 128  ;;  %p832_p13 = scmp.lt.s32.totalorder %s1078_s21, %s1184_s1 }
  0x3d   : > { %p829_p9 = pnand %p828_p7, %p827_p2  ;;  %p833_p10 = scmp.lt.s32.totalorder %s831_s16, %s826_s13 }
  0x3f   : > { %p830_p12 = pneg %p829_p9  ;;  %p834_p0 = por %p833_p10, %p832_p13 }
  0x41   : > { %p835_p3 = pnand %p834_p0, %p830_p12 }
  0x43   : > { %838 = shalt.err (!%p835_p3)
}
  0x44   : > { %s839_s22 = scalar_lea.vmem %s279_s23, 64  ;;  %s933_s19 = smov [#allocation6]  }
  0x45   : > { %p840_p1 = scmp.ne.s32.totalorder %s279_s23, %s839_s22  ;;  %s844_s0 = sshll.u32 %s933_s19, 4  ;;  %s845_s0 = int_to_ptr.vmem [resolvable:$false] %s844_s0 }
  0x46   : > { %s846_s3 = scalar_lea.vmem %s845_s0, 128  ;;  %p847_p2 = scmp.lt.s32.totalorder %s279_s23, %s845_s0 }
  0x47   : > { %p842_p6 = pnand %p840_p1, %p828_p7  ;;  %p848_p9 = scmp.lt.s32.totalorder %s846_s3, %s839_s22 }
  0x49   : > { %p843_p5 = pneg %p842_p6  ;;  %p849_p4 = por %p848_p9, %p847_p2 }
  0x4b   : > { %p850_p8 = pnand %p849_p4, %p843_p5 }
  0x4d   : > { %853 = shalt.err (!%p850_p8)
}
  0x4e   : > { %702 = dma.hbm_to_vmem [thread:$0]  (!%p1080_p11), %s1078_s21, 64, %s279_s23, %s268_s10  }
  0x4f   : > { %p1205_p12 = scmp.ne.s32.totalorder %s1199_s9, 0 }
  0x50   : > { %p1206_p13 = scmp.eq.s32.totalorder (!%p1205_p12), %s999_s28, 0 }
  0x51   : > { %293 = sbr.rel (%p1205_p12) target bundleno = 603 (0x25b), region = 48 }
  0x56   : > { %897 = dma.done.wait (%p1206_p13), [#allocation5], 16   ;;  %p1207_p1 = pmov %p1206_p13 }
  0x57   : > { %s1105_s0 = sand.u32 1, %s918_s25   ;;  %p1208_p4 = scmp.ne.s32.totalorder %s1197_s30, 0 }
  0x58   : > { %899 = vsyncadd (%p1207_p1), [#allocation5], 4294967280  ;;  %s635_s3 = sshll.u32 %s1105_s0, 2  ;;  %s300_s13 = scalar_lea.sflag [#allocation3], %s1105_s0 }
  0x59   : > { %s1109_s29 = scalar_lea.vmem [#allocation6], %s635_s3 }
  0x5a   : > { %901 = dma.done.wait (%p1208_p4), %s300_s13, 64  }
  0x5b   : > { %903 = vsyncadd (%p1208_p4), %s300_s13, 4294967232  ;;  %p1209_p6 = pmov %p1207_p1 }
  0x5c   : > { %p1210_p8 = pmov %p1207_p1 }
  0x5d   : > { %905 = dma.done.wait (%p1209_p6), [#allocation8], 512  }
  0x5e   : > { %907 = vsyncadd (%p1210_p8), [#allocation8], 4294966784 }
  0x5f   : > { %316 = sfence }
  0x60   : > { %s349_s9 = sld [smem:[#allocation2 + %s999_s28]]  ;;  %v755_v0 = vld [vmem:[#allocation7 + $0x8] sm:$0xff]   ;;  %v934_v1 = vmov 0.0   ;;  %v756_v2 = vld [vmem:[#allocation7] sm:$0xff]   ;;  %vm935_vm0 = vmmov 0   ;;  %s936_s23 = smov 1.0   ;;  %v350_v5 = vlaneseq }
  0x61   : > { %655 = vmatprep.subr.bf16.mxu0 %v934_v1  ;;  %663 = vmatprep.subr.bf16.mxu1 %v934_v1  ;;  %v356_v8 = vld [vmem:[%s1109_s29] sm:$0xf]  ;;  %vm359_vm2 = vcmask 261120   ;;  %v758_v23 = vld [vmem:[#allocation9] sm:$0xff]   ;;  %p345_p11 = scmp.lt.s32.totalorder %s999_s28, 1  ;;  %s646_s29 = sshll.u32 %s999_s28, 4 }
  0x62   : > { %656 = vmatpush3.bf16.msra.mxu0 %v755_v0  ;;  %659 = vmatprep.mubr.msk.bf16.mxu0 %vm935_vm0, %v934_v1  ;;  %v351_v6 = vshrl.u32 %v350_v5, 7  ;;  %v357_v9 = vunpack.c.l.bf16 %v356_v8  ;;  %v757_v22 = vld [vmem:[#allocation9 + $0x8] sm:$0xff]   ;;  %p1211_p10 = scmp.ne.s32.totalorder %s1203_s18, 0 }
  0x63   : > { %657 = vmatprep.subr.bf16.mxu0 %v934_v1  ;;  %667 = vmatprep.mubr.msk.bf16.mxu1 %vm935_vm0, %v934_v1  ;;  %v381_v24 = vld [vmem:[%s1187_s4] sm:$0x1]  ;;  %s346_s17 = scalar_select %p345_p11, %s999_s28, 1 }
  0x64   : > { %664 = vmatpush3.bf16.msra.mxu1 %v757_v22  ;;  %v449_v36 = vld [vmem:[%s1189_s6] sm:$0x1]  ;;  %s937_s28 = smov [#allocation10]  }
  0x65   : > { %665 = vmatprep.subr.bf16.mxu1 %v934_v1  ;;  %s347_s19 = scalar_lea.vmem %s1185_s2, %s346_s17  ;;  %s858_s16 = sshll.u32 %s937_s28, 4  ;;  %s859_s16 = int_to_ptr.vmem [resolvable:$false] %s858_s16 }
  0x66   : > { %p367_p5 = scmp.lt.s32.totalorder %s349_s9, 8  ;;  %658 = vmatpush3.bf16.msra.mxu0 %v756_v2  ;;  %v352_v7 = vstv %s349_s9  ;;  %v438_v30 = vld [vmem:[%s347_s19] sm:$0x1]  ;;  %s860_s17 = scalar_lea.vmem %s859_s16, 32 }
  0x67   : > { %vm353_vm1 = vcmp.lt.s32.totalorder %v351_v6, %v352_v7  ;;  %vm439_vm3 = vcmp.ge.s32.totalorder %v438_v30, 838861 }
  0x68   : > { %s368_s30 = scalar_select %p367_p5, %s349_s9, 8  ;;  %v638_v10 = vsel %vm353_vm1, 1.0, %v934_v1  ;;  %666 = vmatpush3.bf16.msra.mxu1 %v758_v23  ;;  %v642_v31 = vsel %vm439_vm3, 1.0, %v934_v1 }
  0x69   : > { %v358_v11 = vmul.f32 %v638_v10, %v357_v9  ;;  %s344_s9 = scalar_lea.vmem [#allocation10], %s1105_s0 }
  0x6a   : > { %s369_s21 = scvt.s32.f32 %s368_s30  ;;  %s519_s30 = sshll.u32 %s344_s9, 4  ;;  %s1142_s30 = int_to_ptr.vmem [resolvable:$true] %s519_s30 }
  0x6b   : > { %v360_v12 = vsel %vm359_vm2, %v358_v11, 0.0  ;;  %s854_s20 = scalar_lea.vmem %s1142_s30, 16  ;;  %p861_p2 = scmp.lt.s32.totalorder %s1142_s30, %s859_s16 }
  0x6c   : > { %s370_s10 = smax.f32 %s936_s23, %s369_s21  ;;  %v361_v13 = vrot.slane %v360_v12, 4  ;;  %p855_p7 = scmp.ne.s32.totalorder %s1142_s30, %s854_s20 }
  0x6d   : > { %v371_v3 = vstv %s370_s10  ;;  %s1140_s10 = scalar_lea.hbm %s1190_s7, %s646_s29  ;;  %p862_p9 = scmp.lt.s32.totalorder %s860_s17, %s854_s20 }
  0x6e   : > { %759 = vrcp.f32 %v371_v3  ;;  %v362_v14 = vadd.f32 %v361_v13, %v360_v12  ;;  %p856_p0 = pnand %p855_p7, %p1211_p10 }
  0x6f   : > { %p863_p12 = por %p862_p9, %p861_p2 }
  0x70   : > { %v363_v15 = vrot.slane %v362_v14, 2  ;;  %p857_p3 = pneg %p856_p0 }
  0x72   : > { %v364_v16 = vadd.f32 %v363_v15, %v362_v14  ;;  %p864_p13 = pnand %p863_p12, %p857_p3 }
  0x74   : > { %v365_v17 = vrot.slane %v364_v16, 1 }
  0x76   : > { %v366_v18 = vadd.f32 %v365_v17, %v364_v16 }
  0x7b   : > { %v760_v4 = vpop.eup %759 }
  0x7c   : > { %671 = vpush %v760_v4 }
  0xad   : > { %s672_s12 = spop %671 }
  0xae   : > { %v374_v19 = vstv %s672_s12  ;;  %s507_s12 = scalar_lea.sflag [#allocation4], %s1105_s0 }
  0xaf   : > { %v375_v20 = vmul.f32 %v374_v19, %v366_v18 }
  0xb1   : > { %v376_v21 = vpack.c.bf16 %v375_v20, %v375_v20 }
  0xb3   : > { %660 = vmatmul.mubr.msk.bf16.vlgmr.msra.gmra.mxu0 %vm359_vm2, %v376_v21 }
 0x173   : > { %v431_v25 = vpop.f32.mrf.mxu0 }
 0x174   : > { %v432_v26 = vadd.f32 %v431_v25, %v381_v24 }
 0x175   : > { %v661_v27 = vpop.f32.mrf.mxu0 }
 0x176   : > { %761 = vtanh.f32 %v432_v26 }
 0x177   : > { %v434_v28 = vpop.f32.mrf.mxu0 }
 0x179   : > { %v662_v29 = vpop.f32.mrf.mxu0 }
 0x183   : > { %v762_v32 = vpop.eup %761 }
 0x184   : > { %v442_v33 = vmul.f32 %v762_v32, %v642_v31 }
 0x186   : > { %v443_v34 = vmul.f32 1.1111112, %v442_v33 }
 0x188   : > { %v444_v35 = vpack.c.bf16 %v443_v34, %v443_v34 }
 0x18a   : > { %668 = vmatmul.mubr.msk.bf16.vlgmr.msra.gmra.mxu1 %vm359_vm2, %v444_v35 }
 0x24a   : > { %v499_v37 = vpop.f32.mrf.mxu1 }
 0x24b   : > { %v500_v38 = vadd.f32 %v499_v37, %v449_v36 }
 0x24c   : > { %v669_v39 = vpop.f32.mrf.mxu1 }
 0x24d   : > { %505 = vst [vmem:[%s344_s9] sm:$0x1] %v500_v38 }
 0x24e   : > { %v502_v40 = vpop.f32.mrf.mxu1 }
 0x24f   : > { %867 = shalt.err (!%p864_p13)
}
 0x250   : > { %s868_s14 = scalar_lea.hbm %s1140_s10, 16  ;;  %s872_s19 = scalar_lea.hbm %s1190_s7, 32 }
 0x251   : > { %p869_p1 = scmp.ne.s32.totalorder %s1140_s10, %s868_s14  ;;  %p873_p8 = scmp.lt.s32.totalorder %s1140_s10, %s1190_s7 }
 0x252   : > { %p874_p5 = scmp.lt.s32.totalorder %s872_s19, %s868_s14 }
 0x253   : > { %p870_p4 = pnand %p869_p1, %p1211_p10 }
 0x254   : > { %p875_p11 = por %p874_p5, %p873_p8 }
 0x255   : > { %p871_p6 = pneg %p870_p4 }
 0x257   : > { %p876_p7 = pnand %p875_p11, %p871_p6 }
 0x259   : > { %879 = shalt.err (!%p876_p7)
}
 0x25a   : > { %687 = dma.vmem_to_hbm [thread:$0]  (%p1211_p10), %s1142_s30, 16, %s1140_s10, %s507_s12   ;;  %v670_v41 = vpop.f32.mrf.mxu1 }
 0x25b PF: > { %s531_s29 = sand.u32 1, %s914_s24   ;;  %p1212_p0 = scmp.ne.s32.totalorder %s1198_s8, 0 }
 0x25c   : > { %p1213_p3 = scmp.ge.s32.totalorder %s926_s27, 2  ;;  %s532_s9 = scalar_lea.sflag [#allocation4], %s531_s29 }
 0x25e   : > { %p704_p2 = pnand %p1213_p3, %p1212_p0 }
 0x260   : > { %p705_p9 = pneg %p704_p2 }
 0x262   : > { %909 = dma.done.wait (%p705_p9), %s532_s9, 16  }
 0x263   : > { %911 = vsyncadd (%p705_p9), %s532_s9, 4294967280  ;;  %p22_p12 = scmp.ge.s32.totalorder %s1055_s11, 4   ;;  %s1214_s24 = smov %s918_s25 }
 0x264   : > { %s1215_s25 = smov %s922_s26  ;;  %s1216_s26 = smov %s1065_s15 }
 0x265   : > { %s1217_s27 = smov %s1055_s11  ;;  %24 = sbr.rel (!%p22_p12) target bundleno = 10 (0xa), region = 109 }
 0x26a   :  { %536 = vsyncpa [#allocation3], 1 }
 0x26b   :  { %538 = vsyncpa [#allocation3 + $0x1], 1 }
 0x26c   :  { %539 = vsyncpa [#allocation8], 1 }
 0x26d   :  { %540 = vsyncpa [#allocation4], 1 }
 0x26e   :  { %542 = vsyncpa [#allocation4 + $0x1], 1 }
 0x26f   :  { %543 = vsyncpa [#allocation5], 1 }
 0x270   :  { %545 = vsyncpa [#allocation5 + $0x1], 1 }

</bundles_post_ra>
